<compile_context>
chip_gen: v7x
topology: tpu7x:2x2x1
jax: 0.10.0
libtpu: 0.0.40
codegen_flags: <defaults>
</compile_context>

<pallas_src>
import functools

import jax
import jax.numpy as jnp
from jax import lax
from jax.experimental import pallas as pl
from jax.experimental.pallas import tpu as pltpu

SMOOTH = 1e-5
_TM_MAX = 8192                   # max lane tile over flattened spatial axis
_TILE_BYTES_BUDGET = 1 << 20     # ~1 MiB probability tile (double-buffered by Pallas)


def _masked_ce_kernel(prob_ref, tgt_ref, cw_ref, out_ref, acc_sum, acc_cnt,
                      *, smooth, size_average, hw):
    n = pl.program_id(0)
    i = pl.program_id(1)
    is_first = jnp.logical_and(n == 0, i == 0)
    is_last = jnp.logical_and(n == pl.num_programs(0) - 1,
                              i == pl.num_programs(1) - 1)

    @pl.when(is_first)
    def _():
        acc_sum[...] = jnp.zeros_like(acc_sum)
        acc_cnt[...] = jnp.zeros_like(acc_cnt)

    p = prob_ref[...]                      # (C, TM) probabilities (any float dtype)
    t = tgt_ref[...]                       # (1, TM) int32 target class ids
    cw = cw_ref[...]                       # (C, 1)  f32 class weights

    C, TM = p.shape

    # one-hot select over the class (sublane) axis — equivalent to the scatter_
    cls = lax.broadcasted_iota(jnp.int32, (C, TM), 0)          # (C, TM)
    one_hot = cls == t                                         # (C, TM) bool

    p32 = p.astype(jnp.float32)
    pt = jnp.sum(jnp.where(one_hot, p32, 0.0), axis=0, keepdims=True)   # (1, TM)
    w = jnp.sum(jnp.where(one_hot, cw, 0.0), axis=0, keepdims=True)     # (1, TM)

    # clip + log only on the selected row (select-before-transcendental)
    logpt = jnp.log(jnp.clip(pt, smooth, 1.0))                 # (1, TM)

    # in-kernel mask for the ragged HW tail (no mask stream, no padding of inputs);
    # also squashes any garbage read from the out-of-bounds part of a partial block
    lane = lax.broadcasted_iota(jnp.int32, (1, TM), 1)
    valid = (i * TM + lane) < hw                               # (1, TM) bool

    loss = jnp.where(valid, -(w * (logpt + smooth)), 0.0)      # (1, TM)

    acc_sum[...] += loss                                       # pure VPU add
    acc_cnt[...] += (loss > 0.0).astype(jnp.int32)             # exact int32 count

    @pl.when(is_last)
    def _():
        total = jnp.sum(acc_sum[...], keepdims=True)           # (1, 1) f32
        if size_average:
            cnt = jnp.sum(acc_cnt[...], keepdims=True).astype(jnp.float32)
            out_ref[...] = total / (cnt + 1.0)
        else:
            out_ref[...] = total


def masked_cross_entropy(logit, target, class_weight=None,
                         smooth=SMOOTH, size_average=True):
    """logit: (N, C, *spatial) probabilities (apply_nonlin=None); target: (N, 1, *spatial) ints."""
    N, C = logit.shape[0], logit.shape[1]

    # Native layout — reshape only (no transpose, no pad): (N, C, HW) / (N, 1, HW)
    probs = logit.reshape(N, C, -1)
    HW = probs.shape[2]
    tgt = target.reshape(N, 1, -1).astype(jnp.int32)

    if class_weight is None:
        cw = jnp.ones((C,), jnp.float32)
    else:
        cw = jnp.asarray(class_weight, jnp.float32)
    cw = cw.reshape(C, 1)

    # Lane tile: as large as reasonable, multiple of 128, bounded by a ~1 MiB
    # probability tile (keeps double-buffered VMEM tiny on every generation,
    # including v5e's 16 MiB default scoped limit and v7x's 64 MiB VMEM).
    itemsize = probs.dtype.itemsize
    tm_cap = max(128, (_TILE_BYTES_BUDGET // (C * itemsize)) // 128 * 128)
    hw_pad = ((HW + 127) // 128) * 128
    TM = int(min(_TM_MAX, tm_cap, hw_pad))
    num_tiles = (HW + TM - 1) // TM

    grid = (N, num_tiles)
    out = pl.pallas_call(
        functools.partial(_masked_ce_kernel, smooth=smooth,
                          size_average=size_average, hw=HW),
        out_shape=jax.ShapeDtypeStruct((1, 1), jnp.float32),
        grid_spec=pltpu.PrefetchScalarGridSpec(
            num_scalar_prefetch=0,
            grid=grid,
            in_specs=[
                # probabilities: (N, C, HW) -> kernel sees (C, TM)
                pl.BlockSpec((pl.Squeezed(), C, TM), lambda n, i: (n, 0, i)),
                # targets: (N, 1, HW) -> kernel sees (1, TM)
                pl.BlockSpec((pl.Squeezed(), 1, TM), lambda n, i: (n, 0, i)),
                # class weights: (C, 1), replicated across the grid
                pl.BlockSpec((C, 1), lambda n, i: (0, 0)),
            ],
            out_specs=pl.BlockSpec((1, 1), lambda n, i: (0, 0)),
            scratch_shapes=[
                pltpu.VMEM((1, TM), jnp.float32),   # running loss sum (per lane)
                pltpu.VMEM((1, TM), jnp.int32),     # running (loss>0) count (per lane)
            ],
        ),
        compiler_params=pltpu.CompilerParams(
            dimension_semantics=("arbitrary", "arbitrary")),
    )(probs, tgt, cw)
    return out[0, 0]


def _reference(logit, target, class_weight=None, smooth=SMOOTH, size_average=True):
    N, C = logit.shape[0], logit.shape[1]
    l = logit.reshape(N, C, -1).transpose(0, 2, 1).reshape(-1, C).astype(jnp.float32)
    t = target.reshape(-1).astype(jnp.int32)
    one_hot = jax.nn.one_hot(t, C, dtype=jnp.float32)
    logpt = jnp.log(jnp.clip(l, smooth, 1.0))
    ce = jnp.sum(one_hot * logpt, axis=1) + smooth
    cw = jnp.ones((C,), jnp.float32) if class_weight is None else jnp.asarray(class_weight, jnp.float32)
    loss = -cw[t] * ce
    if size_average:
        return jnp.sum(loss) / (jnp.sum(loss > 0) + 1)
    return jnp.sum(loss)


if __name__ == "__main__":
    key = jax.random.PRNGKey(0)
    k1, k2 = jax.random.split(key)
    N, C, H, W = 2, 4, 16, 16

    # Module is used with apply_nonlin=None, so feed probabilities directly.
    raw = jax.random.normal(k1, (N, C, H, W), jnp.float32)
    probs = jax.nn.softmax(raw, axis=1)
    target = jax.random.randint(k2, (N, 1, H, W), 0, C, jnp.int32)

    out = masked_cross_entropy(probs, target)
    out = jax.block_until_ready(out)

    ref = _reference(probs, target)
    assert abs(float(out) - float(ref)) < 1e-3 * max(1.0, abs(float(ref))), (float(out), float(ref))
    print("KERNEL_OK")
</pallas_src>

<mosaic_0001>
module attributes {stable_mosaic.version = 11 : i64} {
  func.func @_masked_ce_kernel(%arg0: i32, %arg1: i32, %arg2: memref<1x4x256xf32, #tpu.memory_space<vmem>>, %arg3: memref<1x1x256xi32, #tpu.memory_space<vmem>>, %arg4: memref<4x1xf32, #tpu.memory_space<vmem>>, %arg5: memref<1x1xf32, #tpu.memory_space<vmem>>, %arg6: memref<1x256xf32, #tpu.memory_space<vmem>>, %arg7: memref<1x256xi32, #tpu.memory_space<vmem>>) attributes {dimension_semantics = [#tpu.dimension_semantics<arbitrary>, #tpu.dimension_semantics<arbitrary>], iteration_bounds = array<i64: 2, 1>, scalar_prefetch = 0 : i64, scratch_operands = 2 : i64, tpu.core_type = #tpu.core_type<tc>, window_params = [{transform_indices = @transform_0, window_bounds = array<i64: 1, 4, 256>}, {transform_indices = @transform_1, window_bounds = array<i64: 1, 1, 256>}, {pipeline_mode = #tpu.pipeline_mode<synchronous>, transform_indices = @transform_2, window_bounds = array<i64: 4, 1>}, {pipeline_mode = #tpu.pipeline_mode<synchronous>, transform_indices = @transform_3, window_bounds = array<i64: 1, 1>}]} {
    %c0_i32 = arith.constant 0 : i32
    %0 = arith.cmpi eq, %arg0, %c0_i32 : i32
    %c0_i32_0 = arith.constant 0 : i32
    %1 = arith.cmpi eq, %arg1, %c0_i32_0 : i32
    %2 = arith.andi %0, %1 : i1
    %c1_i32 = arith.constant 1 : i32
    %3 = arith.cmpi eq, %arg0, %c1_i32 : i32
    %c0_i32_1 = arith.constant 0 : i32
    %4 = arith.cmpi eq, %arg1, %c0_i32_1 : i32
    %5 = arith.andi %3, %4 : i1
    %6 = arith.extui %2 : i1 to i32
    %c0_i32_2 = arith.constant 0 : i32
    %7 = arith.cmpi ne, %6, %c0_i32_2 : i32
    scf.if %7 {
      %cst_29 = arith.constant 0.000000e+00 : f32
      %55 = vector.broadcast %cst_29 : f32 to vector<1x256xf32>
      %c0_30 = arith.constant 0 : index
      %c0_31 = arith.constant 0 : index
      %56 = vector.load %arg6[%c0_30, %c0_31] : memref<1x256xf32, #tpu.memory_space<vmem>>, vector<1x256xf32>
      tpu.vector_store %arg6[%c0_30, %c0_31], %55 {strides = array<i32>} : memref<1x256xf32, #tpu.memory_space<vmem>>, vector<1x256xf32>,
      %c0_i32_32 = arith.constant 0 : i32
      %57 = vector.broadcast %c0_i32_32 : i32 to vector<1x256xi32>
      %c0_33 = arith.constant 0 : index
      %c0_34 = arith.constant 0 : index
      %58 = vector.load %arg7[%c0_33, %c0_34] : memref<1x256xi32, #tpu.memory_space<vmem>>, vector<1x256xi32>
      tpu.vector_store %arg7[%c0_33, %c0_34], %57 {strides = array<i32>} : memref<1x256xi32, #tpu.memory_space<vmem>>, vector<1x256xi32>,
    } else {
    }
    %c0 = arith.constant 0 : index
    %c0_3 = arith.constant 0 : index
    %c0_4 = arith.constant 0 : index
    %8 = vector.load %arg2[%c0, %c0_3, %c0_4] : memref<1x4x256xf32, #tpu.memory_space<vmem>>, vector<1x4x256xf32>
    %9 = vector.shape_cast %8 : vector<1x4x256xf32> to vector<4x256xf32>
    %c0_5 = arith.constant 0 : index
    %c0_6 = arith.constant 0 : index
    %c0_7 = arith.constant 0 : index
    %10 = vector.load %arg3[%c0_5, %c0_6, %c0_7] : memref<1x1x256xi32, #tpu.memory_space<vmem>>, vector<1x1x256xi32>
    %11 = vector.shape_cast %10 : vector<1x1x256xi32> to vector<1x256xi32>
    %c0_8 = arith.constant 0 : index
    %c0_9 = arith.constant 0 : index
    %12 = vector.load %arg4[%c0_8, %c0_9] : memref<4x1xf32, #tpu.memory_space<vmem>>, vector<4x1xf32>
    %13 = tpu.iota {dimensions = array<i32: 0>} : vector<4x256xi32>
    %14 = vector.broadcast %11 : vector<1x256xi32> to vector<4x256xi32>
    %15 = arith.cmpi eq, %13, %14 : vector<4x256xi32>
    %cst = arith.constant 0.000000e+00 : f32
    %16 = vector.broadcast %cst : f32 to vector<4x256xf32>
    %17 = arith.select %15, %9, %16 : vector<4x256xi1>, vector<4x256xf32>
    %cst_10 = arith.constant dense<0.000000e+00> : vector<256xf32>
    %18 = vector.multi_reduction <add>, %17, %cst_10 [0] : vector<4x256xf32> to vector<256xf32>
    %19 = vector.shape_cast %18 : vector<256xf32> to vector<1x256xf32>
    %cst_11 = arith.constant 0.000000e+00 : f32
    %20 = vector.shape_cast %12 : vector<4x1xf32> to vector<4x1xf32>
    %21 = vector.broadcast %20 : vector<4x1xf32> to vector<4x256xf32>
    %22 = vector.broadcast %cst_11 : f32 to vector<4x256xf32>
    %23 = arith.select %15, %21, %22 : vector<4x256xi1>, vector<4x256xf32>
    %cst_12 = arith.constant dense<0.000000e+00> : vector<256xf32>
    %24 = vector.multi_reduction <add>, %23, %cst_12 [0] : vector<4x256xf32> to vector<256xf32>
    %25 = vector.shape_cast %24 : vector<256xf32> to vector<1x256xf32>
    %cst_13 = arith.constant 9.99999974E-6 : f32
    %cst_14 = arith.constant 1.000000e+00 : f32
    %26 = vector.broadcast %cst_13 : f32 to vector<1x256xf32>
    %27 = arith.maximumf %26, %19 : vector<1x256xf32>
    %28 = vector.broadcast %cst_14 : f32 to vector<1x256xf32>
    %29 = arith.minimumf %28, %27 : vector<1x256xf32>
    %30 = math.log %29 : vector<1x256xf32>
    %31 = tpu.iota {dimensions = array<i32: 1>} : vector<1x256xi32>
    %c256_i32 = arith.constant 256 : i32
    %32 = arith.muli %arg1, %c256_i32 : i32
    %33 = vector.broadcast %32 : i32 to vector<1x256xi32>
    %34 = arith.addi %33, %31 : vector<1x256xi32>
    %c256_i32_15 = arith.constant 256 : i32
    %35 = vector.broadcast %c256_i32_15 : i32 to vector<1x256xi32>
    %36 = arith.cmpi slt, %34, %35 : vector<1x256xi32>
    %cst_16 = arith.constant 9.99999974E-6 : f32
    %37 = vector.broadcast %cst_16 : f32 to vector<1x256xf32>
    %38 = arith.addf %30, %37 : vector<1x256xf32>
    %39 = arith.mulf %25, %38 : vector<1x256xf32>
    %cst_17 = arith.constant 0.000000e+00 : f32
    %40 = vector.broadcast %cst_17 : f32 to vector<1x256xf32>
    %41 = arith.subf %40, %39 : vector<1x256xf32>
    %cst_18 = arith.constant 0.000000e+00 : f32
    %42 = vector.broadcast %cst_18 : f32 to vector<1x256xf32>
    %43 = arith.select %36, %41, %42 : vector<1x256xi1>, vector<1x256xf32>
    %c0_19 = arith.constant 0 : index
    %c0_20 = arith.constant 0 : index
    %44 = vector.load %arg6[%c0_19, %c0_20] : memref<1x256xf32, #tpu.memory_space<vmem>>, vector<1x256xf32>
    %45 = arith.addf %44, %43 : vector<1x256xf32>
    %c0_21 = arith.constant 0 : index
    %c0_22 = arith.constant 0 : index
    %46 = vector.load %arg6[%c0_21, %c0_22] : memref<1x256xf32, #tpu.memory_space<vmem>>, vector<1x256xf32>
    tpu.vector_store %arg6[%c0_21, %c0_22], %45 {strides = array<i32>} : memref<1x256xf32, #tpu.memory_space<vmem>>, vector<1x256xf32>,
    %c0_23 = arith.constant 0 : index
    %c0_24 = arith.constant 0 : index
    %47 = vector.load %arg7[%c0_23, %c0_24] : memref<1x256xi32, #tpu.memory_space<vmem>>, vector<1x256xi32>
    %cst_25 = arith.constant 0.000000e+00 : f32
    %48 = vector.broadcast %cst_25 : f32 to vector<1x256xf32>
    %49 = arith.cmpf ogt, %43, %48 : vector<1x256xf32>
    %50 = arith.extui %49 : vector<1x256xi1> to vector<1x256xi32>
    %51 = arith.addi %47, %50 : vector<1x256xi32>
    %c0_26 = arith.constant 0 : index
    %c0_27 = arith.constant 0 : index
    %52 = vector.load %arg7[%c0_26, %c0_27] : memref<1x256xi32, #tpu.memory_space<vmem>>, vector<1x256xi32>
    tpu.vector_store %arg7[%c0_26, %c0_27], %51 {strides = array<i32>} : memref<1x256xi32, #tpu.memory_space<vmem>>, vector<1x256xi32>,
    %53 = arith.extui %5 : i1 to i32
    %c0_i32_28 = arith.constant 0 : i32
    %54 = arith.cmpi ne, %53, %c0_i32_28 : i32
    scf.if %54 {
      %c0_29 = arith.constant 0 : index
      %c0_30 = arith.constant 0 : index
      %55 = vector.load %arg6[%c0_29, %c0_30] : memref<1x256xf32, #tpu.memory_space<vmem>>, vector<1x256xf32>
      %56 = vector.shape_cast %55 : vector<1x256xf32> to vector<1x1x256xf32>
      %cst_31 = arith.constant dense<0.000000e+00> : vector<1xf32>
      %57 = vector.multi_reduction <add>, %56, %cst_31 [1, 2] : vector<1x1x256xf32> to vector<1xf32>
      %58 = vector.shape_cast %57 : vector<1xf32> to vector<1x1x1xf32>
      %59 = vector.extract %58[0, 0, 0] : f32 from vector<1x1x1xf32>
      %60 = vector.broadcast %59 : f32 to vector<1x1xf32>
      %c0_32 = arith.constant 0 : index
      %c0_33 = arith.constant 0 : index
      %61 = vector.load %arg7[%c0_32, %c0_33] : memref<1x256xi32, #tpu.memory_space<vmem>>, vector<1x256xi32>
      %62 = vector.shape_cast %61 : vector<1x256xi32> to vector<1x1x256xi32>
      %cst_34 = arith.constant dense<0> : vector<1xi32>
      %63 = vector.multi_reduction <add>, %62, %cst_34 [1, 2] : vector<1x1x256xi32> to vector<1xi32>
      %64 = vector.shape_cast %63 : vector<1xi32> to vector<1x1x1xi32>
      %65 = vector.extract %64[0, 0, 0] : i32 from vector<1x1x1xi32>
      %66 = vector.broadcast %65 : i32 to vector<1x1xi32>
      %67 = arith.sitofp %66 : vector<1x1xi32> to vector<1x1xf32>
      %cst_35 = arith.constant 1.000000e+00 : f32
      %68 = vector.broadcast %cst_35 : f32 to vector<1x1xf32>
      %69 = arith.addf %67, %68 : vector<1x1xf32>
      %70 = arith.divf %60, %69 : vector<1x1xf32>
      %c0_36 = arith.constant 0 : index
      %c0_37 = arith.constant 0 : index
      %71 = vector.load %arg5[%c0_36, %c0_37] : memref<1x1xf32, #tpu.memory_space<vmem>>, vector<1x1xf32>
      tpu.vector_store %arg5[%c0_36, %c0_37], %70 {strides = array<i32>} : memref<1x1xf32, #tpu.memory_space<vmem>>, vector<1x1xf32>,
    } else {
    }
    return
  }
  func.func @transform_0(%arg0: i32, %arg1: i32) -> (i32, i32, i32) {
    %c0_i32 = arith.constant 0 : i32
    %c0_i32_0 = arith.constant 0 : i32
    return %arg0, %c0_i32, %arg1 : i32, i32, i32
  }
  func.func @transform_1(%arg0: i32, %arg1: i32) -> (i32, i32, i32) {
    %c0_i32 = arith.constant 0 : i32
    %c0_i32_0 = arith.constant 0 : i32
    return %arg0, %c0_i32, %arg1 : i32, i32, i32
  }
  func.func @transform_2(%arg0: i32, %arg1: i32) -> (i32, i32) {
    %c0_i32 = arith.constant 0 : i32
    %c0_i32_0 = arith.constant 0 : i32
    %c0_i32_1 = arith.constant 0 : i32
    return %c0_i32, %c0_i32_0 : i32, i32
  }
  func.func @transform_3(%arg0: i32, %arg1: i32) -> (i32, i32) {
    %c0_i32 = arith.constant 0 : i32
    %c0_i32_0 = arith.constant 0 : i32
    %c0_i32_1 = arith.constant 0 : i32
    return %c0_i32, %c0_i32_0 : i32, i32
  }
}

</mosaic_0001>

<bundles_post_ra>
// kernel: tpu_custom_call.1
= control target key start
LH: loop header
LB: loop body
LE: loop exit
PB: predicated region body
PF: predicated region fallthrough
CT: control target
= control target key end

     0   :  { %8 = vsyncpa [#allocation5], 0  ;;  %s952_s0 = inlined_call_operand.hbm [shape: f32[2,4,256], index: 0, kind: input, shape index: {}]   ;;  %s953_s1 = inlined_call_operand.vmem [shape: s32[2,1,256], index: 1, kind: input, shape index: {}]   ;;  %s954_s2 = inlined_call_operand.vmem [shape: f32[4,1], index: 2, kind: input, shape index: {}]   ;;  %s955_s3 = inlined_call_operand.hbm [shape: f32[1,1], index: 3, kind: output, shape index: {}]  }
   0x1   :  { %10 = vsyncpa [#allocation5 + $0x1], 0 }
   0x2   :  { %11 = vsyncpa [#allocation6], 0  ;;  %s752_s12 = smov 0   ;;  %s754_s13 = smov 0  }
   0x3   :  { %s756_s14 = smov 0   ;;  %s758_s15 = smov 0  }
   0x4   :  { %s760_s16 = smov 0   ;;  %s762_s17 = smov 0  }
   0x5 LB: > { %s518_s18 = sadd.s32 4294967295, %s724_s17   ;;  %s29_s19 = sadd.s32 1, %s720_s16  ;;  %s724_s17 = sphi %s762_s17, %s17_s17   ;;  %s720_s16 = sphi %s760_s16, %s970_s16   ;;  %s716_s15 = sphi %s758_s15, %s969_s15   ;;  %s712_s14 = sphi %s756_s14, %s968_s14   ;;  %s708_s13 = sphi %s754_s13, %s967_s13   ;;  %s704_s12 = sphi %s752_s12, %s966_s12  }
   0x6   : > { %p31_p0 = scmp.ge.s32.totalorder %s29_s19, 2  ;;  %s38_s20 = sadd.s32 1, %s712_s14 }
   0x7   : > { %p45_p1 = scmp.ne.s32.totalorder %s712_s14, %s708_s13  ;;  %p46_p2 = scmp.eq.s32.totalorder %s724_s17, 0 }
   0x8   : > { %s972_s19 = smov (%p31_p0, %s29_s19), 0  ;;  %p51_p4 = scmp.ne.s32.totalorder %s708_s13, %s704_s12 }
   0x9   : > { %p788_p3 = por %p46_p2, %p45_p1  ;;  %s33_s22 = ssub.s32 %s720_s16, %s972_s19 }
   0xa   : > { %p52_p5 = scmp.eq.s32.totalorder %s518_s18, 0  ;;  %p36_p6 = scmp.eq.s32.totalorder %s33_s22, 0 }
   0xb   : > { %p550_p8 = scmp.lt.s32.totalorder %s724_s17, 2  ;;  %s148_s25 = sand.u32 1, %s712_s14  }
   0xc   : > { %p797_p7 = por %p52_p5, %p51_p4  ;;  %s533_s26 = sshll.u32 %s720_s16, 7 }
   0xd   : > { %s803_s24 = scalar_select %p36_p6, %s712_s14, %s38_s20  }
   0xe   : > { %s521_s27 = sshll.u32 %s148_s25, 3  ;;  %s810_s30 = scalar_lea.hbm %s952_s0, %s533_s26 }
   0xf   : > { %s152_s4 = scalar_lea.vmem [#allocation4], %s521_s27  ;;  %p814_p9 = pnand %p550_p8, %p788_p3 }
  0x10   : > { %s162_s5 = sshll.u32 %s152_s4, 4  ;;  %s149_s7 = scalar_lea.sflag [#allocation5], %s148_s25  ;;  %s818_s5 = int_to_ptr.vmem [resolvable:$true] %s162_s5 }
  0x11   : > { %s614_s8 = scalar_lea.hbm %s810_s30, 128  ;;  %p616_p13 = pneg %p814_p9 }
  0x12   : > { %p615_p12 = scmp.ne.s32.totalorder %s810_s30, %s614_s8  ;;  %s619_s11 = scalar_lea.hbm %s952_s0, 256 }
  0x13   : > { %p620_p2 = scmp.lt.u32.totalorder %s810_s30, %s952_s0  ;;  %p621_p3 = scmp.lt.u32.totalorder %s619_s11, %s614_s8 }
  0x14   : > { %p617_p0 = pnand %p616_p13, %p615_p12  ;;  %p623_p5 = scmp.lt.u32.totalorder %s614_s8, %s810_s30 }
  0x15   : > { %p622_p4 = por %p621_p3, %p620_p2 }
  0x16   : > { %p618_p1 = pneg %p617_p0 }
  0x17   : > { %p624_p6 = por %p623_p5, %p622_p4 }
  0x19   : > { %p625_p8 = pnand %p624_p6, %p618_p1 }
  0x1b   : > { %628 = shalt.err (!%p625_p8)
}
  0x1c   : > { %s629_s21 = scalar_lea.vmem %s818_s5, 128  ;;  %s726_s22 = smov [#allocation4]  }
  0x1d   : > { %p630_p12 = scmp.ne.s32.totalorder %s818_s5, %s629_s21  ;;  %s634_s25 = sshll.u32 %s726_s22, 4  ;;  %s635_s25 = int_to_ptr.vmem [resolvable:$false] %s634_s25 }
  0x1e   : > { %s636_s26 = scalar_lea.vmem %s635_s25, 256  ;;  %p637_p11 = scmp.lt.s32.totalorder %s818_s5, %s635_s25 }
  0x1f   : > { %p632_p0 = pnand %p630_p12, %p616_p13  ;;  %p638_p2 = scmp.lt.s32.totalorder %s636_s26, %s629_s21 }
  0x21   : > { %p633_p10 = pneg %p632_p0  ;;  %p639_p3 = por %p638_p2, %p637_p11 }
  0x23   : > { %p640_p4 = pnand %p639_p3, %p633_p10 }
  0x25   : > { %643 = shalt.err (!%p640_p4)
}
  0x26   : > { %549 = dma.hbm_to_vmem [thread:$0]  (!%p814_p9), %s810_s30, 128, %s818_s5, %s149_s7  }
  0x27   : > { %p959_p1 = scmp.lt.s32.totalorder %s724_s17, 3  ;;  %p960_p5 = scmp.ge.s32.totalorder %s724_s17, 1 }
  0x29   : > { %p180_p13 = pnand %p960_p5, %p959_p1 }
  0x2a   : > { %s185_s27 = sand.u32 (!%p180_p13), 1, %s708_s13  }
  0x2b   : > { %183 = sbr.rel (%p180_p13) target bundleno = 492 (0x1ec), region = 32  ;;  %s852_s28 = sshll.u32 (!%p180_p13), %s185_s27, 3 }
  0x2c   : > { %s186_s29 = scalar_lea.sflag (!%p180_p13), [#allocation5], %s185_s27  ;;  %s189_s4 = scalar_lea.vmem (!%p180_p13), [#allocation4], %s852_s28 }
  0x32   : > { %695 = dma.done.wait (%p797_p7), %s186_s29, 128  }
  0x33   : > { %697 = vsyncadd (%p797_p7), %s186_s29, 4294967168  ;;  %p217_p9 = scmp.lt.s32.totalorder %s716_s15, 1  ;;  %p225_p10 = scmp.eq.s32.totalorder %s716_s15, 0 }
  0x34   : > { %p229_p11 = scmp.eq.s32.totalorder %s716_s15, 1  ;;  %v234_v0 = vlaneseq (%p225_p10)  ;;  %v727_v1 = vmov (%p225_p10), 0.0   ;;  %v728_v2 = vmov (%p225_p10), 0  }
  0x35   : > { %s218_s30 = scalar_select %p217_p9, %s716_s15, 1 }
  0x36   : > { %233 = sbr.rel (!%p225_p10) target bundleno = 61 (0x3d), region = 40  ;;  %vm236_vm0 = vcmp.lt.s32.totalorder (%p225_p10), %v234_v0, 256 }
  0x37   : > { %s526_s5 = sshll.u32 %s218_s30, 1  ;;  %238 = vst.msk [vmem:[#allocation2] sm:$0x3] (%p225_p10), %vm236_vm0, %v727_v1  ;;  %239 = vst.msk [vmem:[#allocation3] sm:$0x3] (%p225_p10), %vm236_vm0, %v728_v2 }
  0x38   : > { %s223_s8 = scalar_lea.vmem %s953_s1, %s526_s5 }
  0x3d PF: > { %v242_v3 = vld [vmem:[%s954_s2] sm:$0xf]  ;;  %v729_v4 = vmov 0   ;;  %v243_v5 = vlaneseq  ;;  %v240_v11 = vld [vmem:[%s189_s4] sm:$0xff]  ;;  %vm260_vm3 = vcmask 1043456   ;;  %vm382_vm7 = vcmask (%p229_p11), 1040384  }
  0x3e   : > { %606 = vset.pattern.permute.xlu0 %v729_v4  ;;  %v241_v9 = vld [vmem:[%s223_s8] sm:$0x3]  ;;  %v256_v14 = vcombine.high %v240_v11, %v240_v11  ;;  %v730_v51 = vmov 1966171168   ;;  %vm432_vm8 = vcmask (%p229_p11), 0  }
  0x3f   : > { %277 = vperm.xlu0 %606, %v242_v3   ;;  %v244_v6 = vshrl.u32 %v243_v5, 7  ;;  %v326_v52 = vunpack.c.l.s4 %v730_v51  ;;  %v321_v13 = vld [vmem:[#allocation2] sm:$0x3]  ;;  %vm343_vm6 = vcmp.lt.s32.totalorder %v243_v5, 256 }
  0x41   : > { %v871_v7 = vsub.s32 0, %v244_v6  ;;  %v873_v8 = vsub.s32 1, %v244_v6  ;;  %v327_v59 = vunpack.c.0.s8 %v326_v52 }
  0x43   : > { %v248_v10 = vrot.slane %v241_v9, %v871_v7  ;;  %v252_v12 = vrot.slane %v241_v9, %v873_v8  ;;  %v330_v0 = vsub.s32 %v327_v59, %v244_v6 }
  0x45   : > { %vm877_vm1 = vcmp.eq.s32.totalorder %v244_v6, %v248_v10  ;;  %vm881_vm2 = vcmp.eq.s32.totalorder %v244_v6, %v252_v12 }
  0x46   : > { %v258_v16 = vsel %vm877_vm1, %v240_v11, 0.0  ;;  %v259_v17 = vsel %vm881_vm2, %v256_v14, 0.0 }
  0x47   : > { %v261_v18 = vsel %vm260_vm3, %v258_v16, 0.0  ;;  %v268_v19 = vsel %vm260_vm3, %v259_v17, 0.0  ;;  %v346_v16 = vld [vmem:[#allocation3] sm:$0x3] }
  0x48   : > { %v262_v20 = vrot.slane %v261_v18, 4  ;;  %v269_v21 = vrot.slane %v268_v19, 4 }
  0x4a   : > { %v263_v22 = vadd.f32 %v262_v20, %v261_v18  ;;  %v270_v23 = vadd.f32 %v269_v21, %v268_v19 }
  0x4c   : > { %v264_v24 = vrot.slane %v263_v22, 2  ;;  %v271_v25 = vrot.slane %v270_v23, 2 }
  0x4e   : > { %v265_v26 = vadd.f32 %v264_v24, %v263_v22  ;;  %v272_v27 = vadd.f32 %v271_v25, %v270_v23 }
  0x50   : > { %v266_v28 = vrot.slane %v265_v26, 1  ;;  %v273_v29 = vrot.slane %v272_v27, 1 }
  0x52   : > { %v267_v30 = vadd.f32 %v266_v28, %v265_v26  ;;  %v274_v31 = vadd.f32 %v273_v29, %v272_v27 }
  0x54   : > { %v296_v32 = vmax.f32 %v267_v30, 1e-05  ;;  %v297_v33 = vmax.f32 %v274_v31, 1e-05 }
  0x56   : > { %v298_v34 = vmin.f32 %v296_v32, 1.0  ;;  %v299_v35 = vmin.f32 %v297_v33, 1.0 }
  0x58   : > { %608 = vlog2.f32 %v298_v34 }
  0x59   : > { %610 = vlog2.f32 %v299_v35 }
  0x62   : > { %v609_v41 = vpop.eup %608 }
  0x63   : > { %v611_v44 = vpop.eup %610  ;;  %v301_v49 = vmul.f32 0.6931472, %v609_v41 }
  0x64   : > { %v303_v50 = vmul.f32 0.6931472, %v611_v44 }
  0x65   : > { %v313_v57 = vadd.f32 1e-05, %v301_v49 }
  0x66   : > { %v314_v58 = vadd.f32 1e-05, %v303_v50 }
  0xbe   : > { %v278_v36 = vpop.permute.xlu0 %277 }
  0xbf   : > { %v280_v37 = vsel %vm877_vm1, %v278_v36, 0.0  ;;  %v281_v38 = vsel %vm881_vm2, %v278_v36, 0.0 }
  0xc0   : > { %v282_v39 = vsel %vm260_vm3, %v280_v37, 0.0  ;;  %v289_v40 = vsel %vm260_vm3, %v281_v38, 0.0 }
  0xc1   : > { %v283_v42 = vrot.slane %v282_v39, 4  ;;  %v290_v43 = vrot.slane %v289_v40, 4 }
  0xc3   : > { %v284_v45 = vadd.f32 %v283_v42, %v282_v39  ;;  %v291_v46 = vadd.f32 %v290_v43, %v289_v40 }
  0xc5   : > { %v285_v47 = vrot.slane %v284_v45, 2  ;;  %v292_v48 = vrot.slane %v291_v46, 2 }
  0xc7   : > { %v286_v53 = vadd.f32 %v285_v47, %v284_v45  ;;  %v293_v54 = vadd.f32 %v292_v48, %v291_v46 }
  0xc9   : > { %v287_v55 = vrot.slane %v286_v53, 1  ;;  %v294_v56 = vrot.slane %v293_v54, 1 }
  0xcb   : > { %v288_v60 = vadd.f32 %v287_v55, %v286_v53  ;;  %v295_v61 = vadd.f32 %v294_v56, %v293_v54 }
  0xcd   : > { %v315_v62 = vmul.f32 %v313_v57, %v288_v60  ;;  %v316_v63 = vmul.f32 %v314_v58, %v295_v61 }
  0xcf   : > { %v317_v1 = vsub.f32 0.0, %v315_v62  ;;  %v318_v2 = vsub.f32 0.0, %v316_v63 }
  0xd1   : > { %v324_v3 = vcombine.low %v317_v1, %v318_v2  ;;  %vm347_vm4 = vcmp.gt.f32.partialorder %v317_v1, 0.0  ;;  %vm348_vm5 = vcmp.gt.f32.partialorder %v318_v2, 0.0 }
  0xd2   : > { %v349_v9 = vsel %vm347_vm4, 1, %v729_v4  ;;  %v350_v10 = vsel %vm348_vm5, 1, %v729_v4 }
  0xd3   : > { %v331_v11 = vrot.slane %v324_v3, %v330_v0  ;;  %v351_v12 = vcombine.low %v349_v9, %v350_v10 }
  0xd5   : > { %v338_v14 = vrot.slane %v331_v11, %v330_v0  ;;  %v358_v15 = vrot.slane %v351_v12, %v330_v0  ;;  %369 = sbr.rel (!%p229_p11) target bundleno = 467 (0x1d3), region = 44 }
  0xd7   : > { %v340_v17 = vadd.f32 %v338_v14, %v321_v13  ;;  %v365_v18 = vrot.slane %v358_v15, %v330_v0 }
  0xd9   : > { %345 = vst.msk [vmem:[#allocation2] sm:$0x3] %vm343_vm6, %v340_v17  ;;  %v366_v6 = vadd.s32 %v365_v18, %v346_v16 }
  0xdb   : > { %367 = vst.msk [vmem:[#allocation3] sm:$0x3] %vm343_vm6, %v366_v6 }
  0xe0   : > { %v370_v20 = vld [vmem:[#allocation2] sm:$0x3] }
  0xe1   : > { %v375_v22 = vrot.slane %v370_v20, %v871_v7  ;;  %v379_v5 = vrot.slane %v370_v20, %v873_v8 }
  0xe2   : > { %v396_v19 = vld [vmem:[#allocation3] sm:$0x3] }
  0xe3   : > { %v400_v4 = vrot.slane %v396_v19, %v871_v7  ;;  %v404_v21 = vrot.slane %v396_v19, %v873_v8  ;;  %v383_v25 = vsel %vm382_vm7, %v375_v22, 0.0  ;;  %v384_v26 = vsel %vm382_vm7, %v379_v5, 0.0 }
  0xe4   : > { %v385_v28 = vadd.f32 %v384_v26, %v383_v25 }
  0xe5   : > { %v405_v23 = vsel %vm382_vm7, %v400_v4, 0  ;;  %v406_v24 = vsel %vm382_vm7, %v404_v21, 0 }
  0xe6   : > { %v407_v27 = vadd.s32 %v406_v24, %v405_v23  ;;  %386 = vadd.xlane.f32.xlu1 %v385_v28 }
  0xe8   : > { %v409_v29 = vshrl.u32 %v407_v27, 16  ;;  %v408_v30 = vand.u32 65535, %v407_v27 }
  0xea   : > { %v411_v31 = vcvt.s32.f32 %v409_v29  ;;  %v410_v32 = vcvt.s32.f32 %v408_v30 }
  0xec   : > { %414 = vadd.xlane.f32.xlu0 %v411_v31 }
  0xf0   : > { %412 = vadd.xlane.f32.xlu0 %v410_v32 }
 0x173   : > { %v387_v33 = vpop.xlane.xlu1 %386 }
 0x174   : > { %v388_v34 = vrot.slane %v387_v33, 4 }
 0x176   : > { %v389_v35 = vadd.f32 %v388_v34, %v387_v33 }
 0x178   : > { %v390_v37 = vrot.slane %v389_v35, 2 }
 0x179   : > { %v415_v36 = vpop.xlane.xlu0 %414 }
 0x17a   : > { %v417_v7 = vcvt.f32.s32 %v415_v36  ;;  %v391_v8 = vadd.f32 %v390_v37, %v389_v35 }
 0x17c   : > { %v418_v39 = vshll.u32 %v417_v7, 16  ;;  %v392_v41 = vrot.slane %v391_v8, 1 }
 0x17d   : > { %v413_v38 = vpop.xlane.xlu0 %412 }
 0x17e   : > { %v416_v40 = vcvt.f32.s32 %v413_v38  ;;  %v393_v43 = vadd.f32 %v392_v41, %v391_v8 }
 0x180   : > { %v419_v42 = vadd.s32 %v418_v39, %v416_v40  ;;  %536 = vpush %v393_v43 }
 0x182   : > { %v420_v44 = vrot.slane %v419_v42, 4 }
 0x184   : > { %v421_v45 = vadd.s32 %v420_v44, %v419_v42 }
 0x186   : > { %v422_v46 = vrot.slane %v421_v45, 2 }
 0x188   : > { %v423_v47 = vadd.s32 %v422_v46, %v421_v45 }
 0x18a   : > { %v424_v48 = vrot.slane %v423_v47, 1 }
 0x18c   : > { %v425_v49 = vadd.s32 %v424_v48, %v423_v47 }
 0x18e   : > { %538 = vpush %v425_v49 }
 0x1b1   : > { %s537_s15 = spop %536 }
 0x1b2   : > { %v395_v54 = vstv %s537_s15 }
 0x1bf   : > { %s539_s10 = spop %538 }
 0x1c0   : > { %v427_v50 = vstv %s539_s10 }
 0x1c1   : > { %v428_v51 = vcvt.s32.f32 %v427_v50 }
 0x1c3   : > { %v429_v52 = vadd.f32 1.0, %v428_v51 }
 0x1c5   : > { %612 = vrcp.f32 %v429_v52 }
 0x1cf   : > { %v613_v53 = vpop.eup %612 }
 0x1d0   : > { %v431_v55 = vmul.f32 %v613_v53, %v395_v54 }
 0x1d2   : > { %433 = vst.msk [vmem:[#allocation7] sm:$0x1] %vm432_vm8, %v431_v55 }
 0x1d3 PF: > { %p908_p7 = scmp.eq.s32.totalorder %s518_s18, 1  ;;  %s731_s12 = smov [#allocation7]  }
 0x1d4   : > { %s441_s20 = sshll.u32 %s731_s12, 4  ;;  %s442_s20 = int_to_ptr.vmem [resolvable:$true] %s441_s20 }
 0x1d5   : > { %s644_s21 = scalar_lea.vmem %s442_s20, 16  ;;  %s650_s22 = scalar_lea.vmem %s442_s20, 32 }
 0x1d6   : > { %p645_p6 = scmp.ne.s32.totalorder %s442_s20, %s644_s21  ;;  %p651_p0 = scmp.lt.s32.totalorder %s442_s20, %s442_s20 }
 0x1d7   : > { %p652_p2 = scmp.lt.s32.totalorder %s650_s22, %s644_s21 }
 0x1d8   : > { %p646_p8 = pnand %p645_p6, %p908_p7 }
 0x1d9   : > { %p653_p3 = por %p652_p2, %p651_p0 }
 0x1da   : > { %p647_p12 = pneg %p646_p8 }
 0x1dc   : > { %p654_p4 = pnand %p653_p3, %p647_p12 }
 0x1de   : > { %657 = shalt.err (!%p654_p4)
}
 0x1df   : > { %s658_s26 = scalar_lea.hbm %s955_s3, 16 }
 0x1e0   : > { %p659_p1 = scmp.ne.s32.totalorder %s955_s3, %s658_s26  ;;  %p664_p9 = scmp.lt.u32.totalorder %s658_s26, %s955_s3 }
 0x1e2   : > { %p660_p5 = pnand %p659_p1, %p908_p7 }
 0x1e4   : > { %p661_p13 = pneg %p660_p5 }
 0x1e6   : > { %p666_p10 = pnand %p664_p9, %p661_p13 }
 0x1e8   : > { %669 = shalt.err (!%p666_p10)
}
 0x1e9   : > { %543 = dma.vmem_to_hbm [thread:$0]  (%p908_p7), %s442_s20, 16, %s955_s3, [#allocation6]  }
 0x1ea   : > { %699 = dma.done.wait (%p908_p7), [#allocation6], 16  }
 0x1eb   : > { %701 = vsyncadd (%p908_p7), [#allocation6], 4294967280 }
 0x1ec PF: > { %s17_s17 = sadd.s32 1, %s724_s17   ;;  %s966_s12 = smov %s708_s13 }
 0x1ed   : > { %p14_p11 = scmp.ge.s32.totalorder %s17_s17, 4   ;;  %s967_s13 = smov %s712_s14 }
 0x1ee   : > { %s968_s14 = smov %s803_s24  ;;  %s969_s15 = smov %s720_s16 }
 0x1ef   : > { %s970_s16 = smov %s972_s19  ;;  %16 = sbr.rel (!%p14_p11) target bundleno = 5 (0x5), region = 80 }
 0x1f6   :  { %454 = vsyncpa [#allocation5], 1 }
 0x1f7   :  { %456 = vsyncpa [#allocation5 + $0x1], 1 }
 0x1f8   :  { %457 = vsyncpa [#allocation6], 1 }
 0x1f9   :  { %459 = vsyncpa [#allocation6 + $0x1], 1 }

</bundles_post_ra>
